<compile_context>
chip_gen: v7x
topology: tpu7x:2x2x1
jax: 0.10.0
libtpu: 0.0.40
codegen_flags: <defaults>
</compile_context>

<pallas_src>
import functools

import jax
import jax.numpy as jnp
import numpy as np
from jax.experimental import pallas as pl
from jax.experimental.pallas import tpu as pltpu


# ---------------------------------------------------------------------------
# Pallas kernel: one batch-BLOCK (bb batch elements) per grid step.
# ---------------------------------------------------------------------------
def _at_block_kernel(patches_ref,   # (bb*Ho*Wo, 9*C) bf16  im2col taps, tap-major channels
                     x_ref,         # transposed: (bb, C, H*W) bf16 ; direct: (bb, H*W, C) bf16
                     w3_ref,        # (9*C, C)   bf16  3x3 conv weights, BN scale pre-folded
                     shift_ref,     # (1, C)     f32   folded  b3*bn_scale + bn_shift
                     pool_ref,      # (bb, bb*Ho*Wo) f32  block-diagonal 1/(Ho*Wo) averaging matrix
                     w1_ref,        # transposed: (out_c, C) f32 ; direct: (C, out_c) f32
                     o_ref,         # transposed: (bb, out_c, H*W) ; direct: (bb, H*W, out_c)  bf16
                     *, transposed):
    # --- 3x3 stride-2 conv for the whole batch-block: ONE MXU matmul, K = 9*C,
    #     M = bb*Ho*Wo (batch-blocking grows MXU M utilization). -------------
    y = jnp.dot(patches_ref[...], w3_ref[...],
                preferred_element_type=jnp.float32)                # (bb*Ho*Wo, C) f32

    # --- conv bias + eval BatchNorm, pre-folded into (w3_eff, shift) --------
    y = y + shift_ref[...]
    # --- LeakyReLU(0.02) -----------------------------------------------------
    y = jnp.where(y >= 0.0, y, 0.02 * y)

    # --- AdaptiveAvgPool2d(1) per batch element, as an MXU matmul against a
    #     block-diagonal averaging matrix (no reshape / XLU reduce). ----------
    pooled = jnp.dot(pool_ref[...], y, preferred_element_type=jnp.float32)   # (bb, C) f32

    # --- sigmoid attention, kept in f32 --------------------------------------
    att = 1.0 / (1.0 + jnp.exp(-pooled))                            # (bb, C) f32

    if transposed:
        # out_c < 128: transposed, lane-dense (out_c, H*W) output.
        # Fold attention into the 1x1 weights in f32, cast ONCE to bf16.
        w1_eff = (w1_ref[...][None, :, :] * att[:, None, :]).astype(jnp.bfloat16)   # (bb, out_c, C)
        out = jnp.einsum("boc,bcm->bom", w1_eff, x_ref[...],
                         preferred_element_type=jnp.float32)        # (bb, out_c, H*W)
    else:
        # out_c >= 128: direct NHWC-flat path, (H*W, out_c) already lane-dense;
        # no wrapper transposes of x or the output needed.
        w1_eff = (w1_ref[...][None, :, :] * att[:, :, None]).astype(jnp.bfloat16)   # (bb, C, out_c)
        out = jnp.einsum("bmc,bco->bmo", x_ref[...], w1_eff,
                         preferred_element_type=jnp.float32)        # (bb, H*W, out_c)

    o_ref[...] = out.astype(o_ref.dtype)


def _pick_batch_block(B, footprint_fn, vmem_budget, max_bb=8):
    """Largest bb <= max_bb dividing B whose per-step block fits the VMEM budget."""
    bb = min(B, max_bb)
    while bb > 1 and (B % bb != 0 or footprint_fn(bb) > vmem_budget):
        bb -= 1
    return bb


# ---------------------------------------------------------------------------
# Wrapper: layout plumbing + pallas_call
# ---------------------------------------------------------------------------
@functools.partial(jax.jit, static_argnames=("out_c",))
def at_block_forward(s_f, d_f, params, out_c):
    # NHWC inputs (B, H, W, df_c); NHWC output (B, H, W, out_c).
    x = jnp.concatenate([s_f, d_f], axis=-1)                        # (B,H,W,C) f32
    B, H, W, C = x.shape
    Ho = (H - 1) // 2 + 1
    Wo = (W - 1) // 2 + 1
    transposed = out_c < 128          # only use the transposed trick for small out_c

    # VMEM budget from the hardware (v5e/v6e: 128 MiB, v7x: 64 MiB).
    try:
        vmem_cap = int(pltpu.get_tpu_info().vmem_capacity_bytes)
    except Exception:
        vmem_cap = 64 * 1024 * 1024
    vmem_budget = min(vmem_cap * 3 // 4, 96 * 1024 * 1024)

    def footprint(bb):
        m = bb * Ho * Wo
        b = 2 * m * 9 * C * 2                       # patches bf16, double-buffered
        b += 2 * bb * H * W * C * 2                 # x block bf16, double-buffered
        b += 2 * bb * H * W * out_c * 2             # bf16 output block, double-buffered
        b += 2 * (9 * C * C * 2 + C * 4 + out_c * C * 4 + bb * m * 4)   # weights/pool
        b += m * C * 4 + bb * H * W * out_c * 4     # f32 temporaries
        return b

    bb = _pick_batch_block(B, footprint, vmem_budget)
    nb = B // bb
    # NOTE: when B is large, bb=8 both grows MXU M and still leaves >= 3-4 grid
    # steps per v7x TensorCore; at B=2 there is only one step per core.

    # --- im2col for the 3x3 stride-2 conv, emitted directly in the
    #     (bb*Ho*Wo, 9*C) layout the single K=9*C matmul consumes. ------------
    xp = jnp.pad(x, ((0, 0), (1, 1), (1, 1), (0, 0)))
    taps = [xp[:, kh:kh + 2 * Ho:2, kw:kw + 2 * Wo:2, :]
            for kh in range(3) for kw in range(3)]                  # 9 x (B,Ho,Wo,C)
    patches = jnp.concatenate(taps, axis=-1)                        # (B,Ho,Wo,9C)
    patches = patches.reshape(nb, bb * Ho * Wo, 9 * C).astype(jnp.bfloat16)

    # --- fold conv bias + eval BatchNorm into the conv weights (f32, then cast).
    bns = params["bn_scale"].reshape(1, C)
    w3_eff = (params["w3"].reshape(9 * C, C) * bns).astype(jnp.bfloat16)
    shift = (params["b3"].reshape(1, C) * bns
             + params["bn_shift"].reshape(1, C)).astype(jnp.float32)

    # --- block-diagonal averaging matrix: AdaptiveAvgPool2d(1) as one MXU matmul.
    pool_mat = jnp.kron(jnp.eye(bb, dtype=jnp.float32),
                        jnp.ones((1, Ho * Wo), jnp.float32)) / float(Ho * Wo)

    if transposed:
        x_in = jnp.transpose(x, (0, 3, 1, 2)).reshape(nb, bb, C, H * W)
        x_in = x_in.astype(jnp.bfloat16)
        w1_in = params["w1"].T.astype(jnp.float32)                  # (out_c, C)  f32 resident
        x_block = (None, bb, C, H * W)
        out_block = (None, bb, out_c, H * W)
        out_shape = jax.ShapeDtypeStruct((nb, bb, out_c, H * W), jnp.bfloat16)
    else:
        x_in = x.reshape(nb, bb, H * W, C).astype(jnp.bfloat16)     # no transpose
        w1_in = params["w1"].astype(jnp.float32)                    # (C, out_c)
        x_block = (None, bb, H * W, C)
        out_block = (None, bb, H * W, out_c)
        out_shape = jax.ShapeDtypeStruct((nb, bb, H * W, out_c), jnp.bfloat16)

    out_elems = B * out_c * H * W
    cost = pl.CostEstimate(
        flops=int(2 * B * Ho * Wo * 9 * C * C + 2 * B * H * W * C * out_c
                  + 2 * B * Ho * Wo * C),
        transcendentals=int(B * C),
        bytes_accessed=int(patches.size * 2 + x_in.size * 2 + out_elems * 2
                           + w3_eff.size * 2 + w1_in.size * 4
                           + shift.size * 4 + pool_mat.size * 4))

    kernel = functools.partial(_at_block_kernel, transposed=transposed)

    out_raw = pl.pallas_call(
        kernel,
        out_shape=out_shape,
        grid=(nb,),
        in_specs=[
            pl.BlockSpec((None, bb * Ho * Wo, 9 * C), lambda i: (i, 0, 0)),
            pl.BlockSpec(x_block, lambda i: (i, 0, 0, 0)),
            pl.BlockSpec((9 * C, C), lambda i: (0, 0)),
            pl.BlockSpec((1, C), lambda i: (0, 0)),
            pl.BlockSpec((bb, bb * Ho * Wo), lambda i: (0, 0)),
            pl.BlockSpec(w1_in.shape, lambda i: (0, 0)),
        ],
        out_specs=pl.BlockSpec(out_block, lambda i: (i, 0, 0, 0)),
        compiler_params=pltpu.CompilerParams(
            dimension_semantics=("parallel",),
            vmem_limit_bytes=int(vmem_budget)),
        cost_estimate=cost,
    )(patches, x_in, w3_eff, shift, pool_mat, w1_in)

    if transposed:
        out = jnp.transpose(out_raw.reshape(B, out_c, H, W), (0, 2, 3, 1))   # bf16 transpose
    else:
        out = out_raw.reshape(B, H, W, out_c)
    return out.astype(jnp.float32)


# ---------------------------------------------------------------------------
# Pure-JAX f32 reference (for correctness check)
# ---------------------------------------------------------------------------
def at_block_reference(s_f, d_f, params, out_c):
    x = jnp.concatenate([s_f, d_f], axis=-1)                        # (B,H,W,C)
    C = x.shape[-1]
    w3_hwio = params["w3"].reshape(3, 3, C, C)                      # (kh, kw, in, out)
    a = jax.lax.conv_general_dilated(
        x, w3_hwio, window_strides=(2, 2), padding=((1, 1), (1, 1)),
        dimension_numbers=("NHWC", "HWIO", "NHWC"))
    a = a + params["b3"][0]
    a = a * params["bn_scale"][0] + params["bn_shift"][0]
    a = jnp.where(a >= 0.0, a, 0.02 * a)
    pooled = jnp.mean(a, axis=(1, 2), keepdims=True)                # (B,1,1,C)
    att = jax.nn.sigmoid(pooled)
    return jnp.einsum("bhwc,co->bhwo", att * x, params["w1"])


# ---------------------------------------------------------------------------
# Deterministic parameter construction (synthetic init, no checkpoints)
# ---------------------------------------------------------------------------
def make_params(key, df_c, out_c):
    C = 2 * df_c
    k1, k2, k3, k4, k5, k6 = jax.random.split(key, 6)
    # Conv2d(C, C, 3, stride=2, pad=1) weights, laid out (kh*kw, in, out)
    w3 = (jax.random.normal(k1, (3, 3, C, C), jnp.float32) * 0.1).reshape(9, C, C)
    b3 = jax.random.normal(k2, (1, C), jnp.float32) * 0.1
    # BatchNorm2d(C) eval mode: fold (gamma, beta, running_mean, running_var)
    gamma = 1.0 + 0.1 * jax.random.normal(k3, (C,), jnp.float32)
    beta = 0.1 * jax.random.normal(k4, (C,), jnp.float32)
    r_mean = 0.05 * jax.random.normal(k5, (C,), jnp.float32)
    r_var = jnp.abs(1.0 + 0.1 * jax.random.normal(k6, (C,), jnp.float32))
    eps = 1e-5
    bn_scale = (gamma / jnp.sqrt(r_var + eps)).reshape(1, C)
    bn_shift = (beta - r_mean * gamma / jnp.sqrt(r_var + eps)).reshape(1, C)
    # conv1x1(C, out_c, bias=False) weights: (in, out)
    w1 = jax.random.normal(jax.random.fold_in(key, 7), (C, out_c),
                           jnp.float32) * 0.1
    return {"w3": w3, "b3": b3, "bn_scale": bn_scale,
            "bn_shift": bn_shift, "w1": w1}


if __name__ == "__main__":
    B, df_c, H, W = 2, 4, 16, 16
    key = jax.random.PRNGKey(0)
    ks, kd, kp1, kp2 = jax.random.split(key, 4)

    # NHWC inputs (B, H, W, df_c)  (== PyTorch NCHW (B, df_c, H, W))
    s_feature = jax.random.normal(ks, (B, H, W, df_c), jnp.float32)
    d_features = jax.random.normal(kd, (B, H, W, df_c), jnp.float32)

    # --- path 1: out_c < 128 -> transposed lane-dense output path -----------
    out_c_small = 8
    params_s = make_params(kp1, df_c, out_c_small)
    out_s = jax.block_until_ready(
        at_block_forward(s_feature, d_features, params_s, out_c_small))
    ref_s = jax.block_until_ready(
        at_block_reference(s_feature, d_features, params_s, out_c_small))
    np.testing.assert_allclose(np.asarray(out_s), np.asarray(ref_s),
                               rtol=1e-2, atol=1e-2)

    # --- path 2: out_c >= 128 -> direct NHWC path (no wrapper transposes) ---
    out_c_big = 128
    params_b = make_params(kp2, df_c, out_c_big)
    out_b = jax.block_until_ready(
        at_block_forward(s_feature, d_features, params_b, out_c_big))
    ref_b = jax.block_until_ready(
        at_block_reference(s_feature, d_features, params_b, out_c_big))
    np.testing.assert_allclose(np.asarray(out_b), np.asarray(ref_b),
                               rtol=1e-2, atol=1e-2)

    print("KERNEL_OK")
</pallas_src>

<mosaic_0001>
module attributes {stable_mosaic.version = 11 : i64} {
  func.func @_at_block_kernel(%arg0: i32, %arg1: memref<1x128x72xbf16, #tpu.memory_space<vmem>>, %arg2: memref<1x2x8x256xbf16, #tpu.memory_space<vmem>>, %arg3: memref<72x8xbf16, #tpu.memory_space<vmem>>, %arg4: memref<1x8xf32, #tpu.memory_space<vmem>>, %arg5: memref<2x128xf32, #tpu.memory_space<vmem>>, %arg6: memref<8x8xf32, #tpu.memory_space<vmem>>, %arg7: memref<1x2x8x256xbf16, #tpu.memory_space<vmem>>) attributes {dimension_semantics = [#tpu.dimension_semantics<parallel>], iteration_bounds = array<i64: 1>, scalar_prefetch = 0 : i64, scratch_operands = 0 : i64, tpu.core_type = #tpu.core_type<tc>, window_params = [{transform_indices = @transform_0, window_bounds = array<i64: 1, 128, 72>}, {transform_indices = @transform_1, window_bounds = array<i64: 1, 2, 8, 256>}, {pipeline_mode = #tpu.pipeline_mode<synchronous>, transform_indices = @transform_2, window_bounds = array<i64: 72, 8>}, {pipeline_mode = #tpu.pipeline_mode<synchronous>, transform_indices = @transform_3, window_bounds = array<i64: 1, 8>}, {pipeline_mode = #tpu.pipeline_mode<synchronous>, transform_indices = @transform_4, window_bounds = array<i64: 2, 128>}, {pipeline_mode = #tpu.pipeline_mode<synchronous>, transform_indices = @transform_5, window_bounds = array<i64: 8, 8>}, {transform_indices = @transform_6, window_bounds = array<i64: 1, 2, 8, 256>}]} {
    %c0 = arith.constant 0 : index
    %c0_0 = arith.constant 0 : index
    %c0_1 = arith.constant 0 : index
    %0 = vector.load %arg1[%c0, %c0_0, %c0_1] : memref<1x128x72xbf16, #tpu.memory_space<vmem>>, vector<1x128x72xbf16>
    %1 = vector.shape_cast %0 : vector<1x128x72xbf16> to vector<128x72xbf16>
    %c0_2 = arith.constant 0 : index
    %c0_3 = arith.constant 0 : index
    %2 = vector.load %arg3[%c0_2, %c0_3] : memref<72x8xbf16, #tpu.memory_space<vmem>>, vector<72x8xbf16>
    %cst = arith.constant dense<0.000000e+00> : vector<128x8xf32>
    %3 = tpu.matmul %1, %2, %cst {dimension_numbers = #tpu.dot_dimension_numbers<[1], [0], [0], [1], [0, 0, 1, 1], [], []>} : vector<128x72xbf16>, vector<72x8xbf16>, vector<128x8xf32> -> vector<128x8xf32>
    %c0_4 = arith.constant 0 : index
    %c0_5 = arith.constant 0 : index
    %4 = vector.load %arg4[%c0_4, %c0_5] : memref<1x8xf32, #tpu.memory_space<vmem>>, vector<1x8xf32>
    %5 = vector.broadcast %4 : vector<1x8xf32> to vector<128x8xf32>
    %6 = arith.addf %3, %5 : vector<128x8xf32>
    %cst_6 = arith.constant 0.000000e+00 : f32
    %7 = vector.broadcast %cst_6 : f32 to vector<128x8xf32>
    %8 = arith.cmpf oge, %6, %7 : vector<128x8xf32>
    %cst_7 = arith.constant 2.000000e-02 : f32
    %9 = vector.broadcast %cst_7 : f32 to vector<128x8xf32>
    %10 = arith.mulf %9, %6 : vector<128x8xf32>
    %11 = arith.select %8, %6, %10 : vector<128x8xi1>, vector<128x8xf32>
    %c0_8 = arith.constant 0 : index
    %c0_9 = arith.constant 0 : index
    %12 = vector.load %arg5[%c0_8, %c0_9] : memref<2x128xf32, #tpu.memory_space<vmem>>, vector<2x128xf32>
    %cst_10 = arith.constant dense<0.000000e+00> : vector<2x8xf32>
    %13 = tpu.matmul %12, %11, %cst_10 {dimension_numbers = #tpu.dot_dimension_numbers<[1], [0], [0], [1], [0, 0, 1, 1], [], []>} : vector<2x128xf32>, vector<128x8xf32>, vector<2x8xf32> -> vector<2x8xf32>
    %cst_11 = arith.constant 0.000000e+00 : f32
    %14 = vector.broadcast %cst_11 : f32 to vector<2x8xf32>
    %15 = arith.subf %14, %13 : vector<2x8xf32>
    %16 = math.exp %15 : vector<2x8xf32>
    %cst_12 = arith.constant 1.000000e+00 : f32
    %17 = vector.broadcast %cst_12 : f32 to vector<2x8xf32>
    %18 = arith.addf %17, %16 : vector<2x8xf32>
    %cst_13 = arith.constant 1.000000e+00 : f32
    %19 = vector.broadcast %cst_13 : f32 to vector<2x8xf32>
    %20 = arith.divf %19, %18 : vector<2x8xf32>
    %c0_14 = arith.constant 0 : index
    %c0_15 = arith.constant 0 : index
    %21 = vector.load %arg6[%c0_14, %c0_15] : memref<8x8xf32, #tpu.memory_space<vmem>>, vector<8x8xf32>
    %22 = vector.shape_cast %21 : vector<8x8xf32> to vector<1x8x8xf32>
    %23 = vector.shape_cast %20 : vector<2x8xf32> to vector<2x1x8xf32>
    %24 = vector.broadcast %22 : vector<1x8x8xf32> to vector<2x8x8xf32>
    %25 = vector.broadcast %23 : vector<2x1x8xf32> to vector<2x8x8xf32>
    %26 = arith.mulf %24, %25 : vector<2x8x8xf32>
    %27 = arith.truncf %26 : vector<2x8x8xf32> to vector<2x8x8xbf16>
    %c0_16 = arith.constant 0 : index
    %c0_17 = arith.constant 0 : index
    %c0_18 = arith.constant 0 : index
    %c0_19 = arith.constant 0 : index
    %28 = vector.load %arg2[%c0_16, %c0_17, %c0_18, %c0_19] : memref<1x2x8x256xbf16, #tpu.memory_space<vmem>>, vector<1x2x8x256xbf16>
    %29 = vector.shape_cast %28 : vector<1x2x8x256xbf16> to vector<2x8x256xbf16>
    "tpu.trace_start"() <{level = 10 : i32, message = "boc,bcm->bom"}> : () -> ()
    %cst_20 = arith.constant dense<0.000000e+00> : vector<2x8x256xf32>
    %30 = tpu.matmul %27, %29, %cst_20 {dimension_numbers = #tpu.dot_dimension_numbers<[2], [1], [1], [2], [0, 0, 0, 1, 1, 2], [0], [0]>} : vector<2x8x8xbf16>, vector<2x8x256xbf16>, vector<2x8x256xf32> -> vector<2x8x256xf32>
    "tpu.trace_stop"() : () -> ()
    %31 = arith.truncf %30 : vector<2x8x256xf32> to vector<2x8x256xbf16>
    %c0_21 = arith.constant 0 : index
    %c0_22 = arith.constant 0 : index
    %c0_23 = arith.constant 0 : index
    %c0_24 = arith.constant 0 : index
    %32 = vector.load %arg7[%c0_21, %c0_22, %c0_23, %c0_24] : memref<1x2x8x256xbf16, #tpu.memory_space<vmem>>, vector<1x2x8x256xbf16>
    %33 = vector.shape_cast %32 : vector<1x2x8x256xbf16> to vector<2x8x256xbf16>
    %34 = vector.shape_cast %31 : vector<2x8x256xbf16> to vector<1x2x8x256xbf16>
    tpu.vector_store %arg7[%c0_21, %c0_22, %c0_23, %c0_24], %34 {strides = array<i32>} : memref<1x2x8x256xbf16, #tpu.memory_space<vmem>>, vector<1x2x8x256xbf16>,
    return
  }
  func.func @transform_0(%arg0: i32) -> (i32, i32, i32) {
    %c0_i32 = arith.constant 0 : i32
    %c0_i32_0 = arith.constant 0 : i32
    %c0_i32_1 = arith.constant 0 : i32
    return %arg0, %c0_i32, %c0_i32_0 : i32, i32, i32
  }
  func.func @transform_1(%arg0: i32) -> (i32, i32, i32, i32) {
    %c0_i32 = arith.constant 0 : i32
    %c0_i32_0 = arith.constant 0 : i32
    %c0_i32_1 = arith.constant 0 : i32
    %c0_i32_2 = arith.constant 0 : i32
    return %arg0, %c0_i32, %c0_i32_0, %c0_i32_1 : i32, i32, i32, i32
  }
  func.func @transform_2(%arg0: i32) -> (i32, i32) {
    %c0_i32 = arith.constant 0 : i32
    %c0_i32_0 = arith.constant 0 : i32
    %c0_i32_1 = arith.constant 0 : i32
    return %c0_i32, %c0_i32_0 : i32, i32
  }
  func.func @transform_3(%arg0: i32) -> (i32, i32) {
    %c0_i32 = arith.constant 0 : i32
    %c0_i32_0 = arith.constant 0 : i32
    %c0_i32_1 = arith.constant 0 : i32
    return %c0_i32, %c0_i32_0 : i32, i32
  }
  func.func @transform_4(%arg0: i32) -> (i32, i32) {
    %c0_i32 = arith.constant 0 : i32
    %c0_i32_0 = arith.constant 0 : i32
    %c0_i32_1 = arith.constant 0 : i32
    return %c0_i32, %c0_i32_0 : i32, i32
  }
  func.func @transform_5(%arg0: i32) -> (i32, i32) {
    %c0_i32 = arith.constant 0 : i32
    %c0_i32_0 = arith.constant 0 : i32
    %c0_i32_1 = arith.constant 0 : i32
    return %c0_i32, %c0_i32_0 : i32, i32
  }
  func.func @transform_6(%arg0: i32) -> (i32, i32, i32, i32) {
    %c0_i32 = arith.constant 0 : i32
    %c0_i32_0 = arith.constant 0 : i32
    %c0_i32_1 = arith.constant 0 : i32
    %c0_i32_2 = arith.constant 0 : i32
    return %arg0, %c0_i32, %c0_i32_0, %c0_i32_1 : i32, i32, i32, i32
  }
}

</mosaic_0001>

<bundles_post_ra>
// kernel: at_block_forward.1
= control target key start
LH: loop header
LB: loop body
LE: loop exit
PB: predicated region body
PF: predicated region fallthrough
CT: control target
= control target key end

     0   :  { %vm123_vm0 = vcmask 588800   ;;  %vm148_vm1 = vcmask 1043456   ;;  %v723_v14 = vmov 0.0|0.0   ;;  %vm724_vm2 = vmmov 0   ;;  %s863_s2 = inlined_call_operand.vmem [shape: bf16[72,8], index: 2, kind: input, shape index: {}]   ;;  %s864_s0 = inlined_call_operand.vmem [shape: bf16[1,128,72], index: 0, kind: input, shape index: {}]   ;;  %s865_s3 = inlined_call_operand.vmem [shape: f32[1,8], index: 3, kind: input, shape index: {}]   ;;  %s866_s4 = inlined_call_operand.vmem [shape: f32[2,128], index: 4, kind: input, shape index: {}]   ;;  %s867_s1 = inlined_call_operand.vmem [shape: bf16[1,2,8,256], index: 1, kind: input, shape index: {}]   ;;  %s868_s5 = inlined_call_operand.vmem [shape: f32[8,8], index: 5, kind: input, shape index: {}]   ;;  %s869_s6 = inlined_call_operand.vmem [shape: bf16[1,2,8,256], index: 6, kind: output, shape index: {}]  }
   0x1   :  { %v702_v0 = vld [vmem:[%s863_s2] sm:$0xff]   ;;  %v703_v1 = vld [vmem:[%s863_s2 + $0x8] sm:$0xff]   ;;  %v704_v2 = vld [vmem:[%s863_s2 + $0x10] sm:$0xff]   ;;  %672 = vmatprep.subr.bf16.mxu1 %v723_v14  ;;  %v725_v15 = vmov 0.0  }
   0x2   :  { %611 = vmatprep.subr.bf16.mxu0 %v702_v0  ;;  %v707_v3 = vld [vmem:[%s864_s0] sm:$0xff]   ;;  %v705_v4 = vld [vmem:[%s863_s2 + $0x18] sm:$0xff]   ;;  %v708_v7 = vld [vmem:[%s864_s0 + $0x8] sm:$0xff]   ;;  %669 = vmatprep.mubr.msk.f32.mxu1 %vm724_vm2, %v725_v15 }
   0x3   :  { %612 = vmatpush3.bf16.msra.mxu0 %v702_v0  ;;  %621 = vmatprep.mubr.msk.bf16.mxu0 %vm123_vm0, %v707_v3  ;;  %v706_v5 = vld [vmem:[%s863_s2 + $0x20] ss:$0 sps:$4 sm:$0xff]   ;;  %v709_v8 = vld [vmem:[%s864_s0 + $0x10] sm:$0xff]   ;;  %v710_v9 = vld [vmem:[%s864_s0 + $0x18] sm:$0xff]  }
   0x4   :  { %613 = vmatprep.subr.bf16.mxu0 %v703_v1  ;;  %v150_v6 = vsel %vm148_vm1, %v706_v5, 0  ;;  %v711_v10 = vld [vmem:[%s864_s0 + $0x20] sm:$0xff]   ;;  %v712_v11 = vld [vmem:[%s864_s0 + $0x28] sm:$0xff]   ;;  %v713_v12 = vld [vmem:[%s864_s0 + $0x30] sm:$0xff]  }
   0x5   :  { %v714_v13 = vld [vmem:[%s864_s0 + $0x38] sm:$0xff]   ;;  %v816_v16 = vld [vmem:[%s865_s3] ss:$0 sm:$0xff] }
   0x7   :  { %614 = vmatpush3.bf16.msra.mxu0 %v703_v1 }
   0x8   :  { %615 = vmatprep.subr.bf16.mxu0 %v704_v2 }
   0xb   :  { %616 = vmatpush3.bf16.msra.mxu0 %v704_v2 }
   0xc   :  { %617 = vmatprep.subr.bf16.mxu0 %v705_v4 }
   0xf   :  { %618 = vmatpush3.bf16.msra.mxu0 %v705_v4 }
  0x10   :  { %696 = vmatprep.subr.msk.bf16.mxu0 %vm148_vm1, %v706_v5 }
  0x13   :  { %620 = vmatpush3.bf16.msra.mxu0 %v150_v6 }
  0x16   :  { %622 = vmatmul.mubr.msk.bf16.vlgmr.msra.gmra.mrb[0].mxu0 %vm123_vm0, %v708_v7 }
  0x17   :  { %625 = vmatprep.mubr.msk.bf16.mxu0 %vm123_vm0, %v709_v8 }
  0x1e   :  { %626 = vmatmul.mubr.msk.bf16.gmra.mrb[4].mxu0 %vm123_vm0, %v710_v9 }
  0x1f   :  { %629 = vmatprep.mubr.msk.bf16.mxu0 %vm123_vm0, %v711_v10 }
  0x26   :  { %630 = vmatmul.mubr.msk.bf16.gmra.mrb[8].mxu0 %vm123_vm0, %v712_v11 }
  0x27   :  { %633 = vmatprep.mubr.msk.bf16.mxu0 %vm123_vm0, %v713_v12 }
  0x2e   :  { %634 = vmatmul.mubr.msk.bf16.gmra.mrb[12].mxu0 %vm123_vm0, %v714_v13 }
  0xe9   :  { %v623_v17 = vpop.f32.mrb[0].mxu0 }
  0xea   :  { %v195_v18 = vadd.f32 %v623_v17, %v816_v16  ;;  %v186_v19 = vpop.f32.mrb[1].mxu0 }
  0xeb   :  { %v187_v20 = vadd.f32 %v816_v16, %v186_v19  ;;  %v624_v21 = vpop.f32.mrb[2].mxu0 }
  0xec   :  { %v267_v22 = vmul.f32 0.02, %v195_v18  ;;  %v198_v23 = vadd.f32 %v624_v21, %v816_v16  ;;  %v189_v24 = vpop.f32.mrb[3].mxu0  ;;  %vm251_vm3 = vcmp.ge.f32.partialorder %v195_v18, 0.0 }
  0xed   :  { %v265_v25 = vmul.f32 0.02, %v187_v20  ;;  %v190_v26 = vadd.f32 %v816_v16, %v189_v24  ;;  %vm249_vm5 = vcmp.ge.f32.partialorder %v187_v20, 0.0 }
  0xee   :  { %vm252_vm4 = vcmp.ge.f32.partialorder %v198_v23, 0.0  ;;  %v268_v27 = vmul.f32 0.02, %v198_v23  ;;  %v283_v29 = vsel %vm251_vm3, %v195_v18, %v267_v22 }
  0xef   :  { %v266_v28 = vmul.f32 0.02, %v190_v26  ;;  %vm250_vm6 = vcmp.ge.f32.partialorder %v190_v26, 0.0  ;;  %v281_v32 = vsel %vm249_vm5, %v187_v20, %v265_v25 }
  0xf0   :  { %v284_v30 = vsel %vm252_vm4, %v198_v23, %v268_v27  ;;  %v412_v27 = vld [vmem:[%s867_s1] sm:$0xff]  ;;  %vm419_vm4 = vcmask 64512  }
  0xf1   :  { %v627_v31 = vpop.f32.mrb[4].mxu0  ;;  %v282_v33 = vsel %vm250_vm6, %v190_v26, %v266_v28  ;;  %v676_v34 = vpack.c.bf16 %v284_v30, %v283_v29  ;;  %v726_v28 = vmov 0   ;;  %v413_v29 = vld [vmem:[%s867_s1 + $0x8] sm:$0xff]  ;;  %v570_v30 = vcombine.high %v412_v27, %v412_v27 }
  0xf2   :  { %v211_v35 = vadd.f32 %v627_v31, %v816_v16  ;;  %v202_v36 = vpop.f32.mrb[5].mxu0  ;;  %v673_v37 = vpack.c.bf16 %v282_v33, %v281_v32  ;;  %v569_v31 = vcombine.low %v412_v27, %v412_v27  ;;  %v574_v32 = vcombine.high %v413_v29, %v413_v29 }
  0xf3   :  { %v203_v38 = vadd.f32 %v816_v16, %v202_v36  ;;  %v628_v39 = vpop.f32.mrb[6].mxu0 }
  0xf4   :  { %v271_v40 = vmul.f32 0.02, %v211_v35  ;;  %v214_v41 = vadd.f32 %v628_v39, %v816_v16  ;;  %v205_v42 = vpop.f32.mrb[7].mxu0  ;;  %674 = vmatpush3.bf16.msra.mxu1 %v673_v37  ;;  %vm255_vm7 = vcmp.ge.f32.partialorder %v211_v35, 0.0  ;;  %v727_v39 = vmov 1966171168  }
  0xf5   :  { %v269_v43 = vmul.f32 0.02, %v203_v38  ;;  %v206_v44 = vadd.f32 %v816_v16, %v205_v42  ;;  %675 = vmatprep.subr.bf16.mxu1 %v723_v14  ;;  %vm253_vm8 = vcmp.ge.f32.partialorder %v203_v38, 0.0 }
  0xf6   :  { %vm256_vm9 = vcmp.ge.f32.partialorder %v214_v41, 0.0  ;;  %v272_v45 = vmul.f32 0.02, %v214_v41  ;;  %v287_v47 = vsel %vm255_vm7, %v211_v35, %v271_v40  ;;  %v377_v40 = vunpack.c.l.s4 %v727_v39 }
  0xf7   :  { %vm254_vm10 = vcmp.ge.f32.partialorder %v206_v44, 0.0  ;;  %v270_v46 = vmul.f32 0.02, %v206_v44  ;;  %v285_v50 = vsel %vm253_vm8, %v203_v38, %v269_v43 }
  0xf8   :  { %677 = vmatpush3.bf16.msra.mxu1 %v676_v34  ;;  %v288_v48 = vsel %vm256_vm9, %v214_v41, %v272_v45  ;;  %v379_v41 = vlaneseq  ;;  %v378_v42 = vunpack.c.0.s8 %v377_v40 }
  0xf9   :  { %v631_v49 = vpop.f32.mrb[8].mxu0  ;;  %678 = vmatprep.subr.bf16.mxu1 %v723_v14  ;;  %v286_v51 = vsel %vm254_vm10, %v206_v44, %v270_v46  ;;  %v682_v52 = vpack.c.bf16 %v288_v48, %v287_v47 }
  0xfa   :  { %v227_v53 = vadd.f32 %v631_v49, %v816_v16  ;;  %v218_v54 = vpop.f32.mrb[9].mxu0  ;;  %v679_v55 = vpack.c.bf16 %v286_v51, %v285_v50  ;;  %v380_v43 = vshrl.u32 %v379_v41, 7  ;;  %v374_v50 = vld [vmem:[%s868_s5] sm:$0xff] }
  0xfb   :  { %v219_v56 = vadd.f32 %v816_v16, %v218_v54  ;;  %v632_v57 = vpop.f32.mrb[10].mxu0 }
  0xfc   :  { %v275_v58 = vmul.f32 0.02, %v227_v53  ;;  %v230_v59 = vadd.f32 %v632_v57, %v816_v16  ;;  %v221_v60 = vpop.f32.mrb[11].mxu0  ;;  %680 = vmatpush3.bf16.msra.mxu1 %v679_v55  ;;  %vm259_vm11 = vcmp.ge.f32.partialorder %v227_v53, 0.0  ;;  %v381_v44 = vsub.s32 %v378_v42, %v380_v43 }
  0xfd   :  { %v273_v61 = vmul.f32 0.02, %v219_v56  ;;  %v222_v62 = vadd.f32 %v816_v16, %v221_v60  ;;  %681 = vmatprep.subr.bf16.mxu1 %v723_v14  ;;  %vm257_vm12 = vcmp.ge.f32.partialorder %v219_v56, 0.0  ;;  %v400_v47 = vsub.s32 0, %v380_v43 }
  0xfe   :  { %vm260_vm13 = vcmp.ge.f32.partialorder %v230_v59, 0.0  ;;  %v276_v63 = vmul.f32 0.02, %v230_v59  ;;  %v291_v1 = vsel %vm259_vm11, %v227_v53, %v275_v58 }
  0xff   :  { %vm258_vm14 = vcmp.ge.f32.partialorder %v222_v62, 0.0  ;;  %v274_v0 = vmul.f32 0.02, %v222_v62  ;;  %v289_v4 = vsel %vm257_vm12, %v219_v56, %v273_v61 }
 0x100   :  { %683 = vmatpush3.bf16.msra.mxu1 %v682_v52  ;;  %v292_v2 = vsel %vm260_vm13, %v230_v59, %v276_v63  ;;  %v573_v52 = vcombine.low %v413_v29, %v413_v29 }
 0x101   :  { %v635_v3 = vpop.f32.mrb[12].mxu0  ;;  %684 = vmatprep.subr.bf16.mxu1 %v723_v14  ;;  %v290_v5 = vsel %vm258_vm14, %v222_v62, %v274_v0  ;;  %v688_v6 = vpack.c.bf16 %v292_v2, %v291_v1 }
 0x102   :  { %v243_v7 = vadd.f32 %v635_v3, %v816_v16  ;;  %v234_v8 = vpop.f32.mrb[13].mxu0  ;;  %v685_v9 = vpack.c.bf16 %v290_v5, %v289_v4  ;;  %v479_v56 = vsel %vm148_vm1, %v573_v52, 0 }
 0x103   :  { %v235_v10 = vadd.f32 %v816_v16, %v234_v8  ;;  %v636_v11 = vpop.f32.mrb[14].mxu0 }
 0x104   :  { %v279_v12 = vmul.f32 0.02, %v243_v7  ;;  %v246_v13 = vadd.f32 %v636_v11, %v816_v16  ;;  %v237_v15 = vpop.f32.mrb[15].mxu0  ;;  %686 = vmatpush3.bf16.msra.mxu1 %v685_v9  ;;  %vm263_vm15 = vcmp.ge.f32.partialorder %v243_v7, 0.0 }
 0x105   :  { %v277_v17 = vmul.f32 0.02, %v235_v10  ;;  %v238_v18 = vadd.f32 %v816_v16, %v237_v15  ;;  %687 = vmatprep.subr.bf16.mxu1 %v723_v14  ;;  %vm261_vm0 = vcmp.ge.f32.partialorder %v235_v10, 0.0  ;;  %v297_v16 = vld [vmem:[%s866_s4] sm:$0x3] }
 0x106   :  { %vm264_vm2 = vcmp.ge.f32.partialorder %v246_v13, 0.0  ;;  %v280_v19 = vmul.f32 0.02, %v246_v13  ;;  %v295_v21 = vsel %vm263_vm15, %v243_v7, %v279_v12 }
 0x107   :  { %vm262_vm3 = vcmp.ge.f32.partialorder %v238_v18, 0.0  ;;  %v278_v20 = vmul.f32 0.02, %v238_v18  ;;  %v293_v23 = vsel %vm261_vm0, %v235_v10, %v277_v17 }
 0x108   :  { %689 = vmatpush3.bf16.msra.mxu1 %v688_v6  ;;  %v296_v22 = vsel %vm264_vm2, %v246_v13, %v280_v19 }
 0x109   :  { %690 = vmatprep.subr.bf16.mxu1 %v723_v14  ;;  %v294_v24 = vsel %vm262_vm3, %v238_v18, %v278_v20  ;;  %v694_v25 = vpack.c.bf16 %v296_v22, %v295_v21 }
 0x10a   :  { %v691_v26 = vpack.c.bf16 %v294_v24, %v293_v23 }
 0x10c   :  { %692 = vmatpush3.bf16.msra.mxu1 %v691_v26 }
 0x10d   :  { %693 = vmatprep.subr.bf16.mxu1 %v723_v14  ;;  %v424_v14 = vsel %vm148_vm1, %v569_v31, 0 }
 0x110   :  { %695 = vmatpush3.bf16.msra.mxu1 %v694_v25 }
 0x111   :  { %571 = vmatprep.subr.msk.bf16.mxu1 %vm148_vm1, %v570_v30 }
 0x113   :  { %670 = vmatmul.mubr.f32.vlgmr.msra.gmra.mrb[0].mxu1 %v297_v16 }
 0x114   :  { %461 = vmatprep.mubr.bf16.mxu1 %v726_v28  ;;  %430 = vmatpush1.bf16.msra.mxu1 %v424_v14 }
 0x115   :  { %575 = vmatprep.subr.msk.bf16.mxu1 %vm148_vm1, %v574_v32 }
 0x1e6   :  { %v364_v33 = vpop.f32.mrb[0].mxu1 }
 0x1e7   :  { %v368_v34 = vsub.f32 0.0, %v364_v33  ;;  %v671_v35 = vpop.f32.mrb[1].mxu1 }
 0x1e9   :  { %v369_v36 = vmul.f32 1.442695, %v368_v34 }
 0x1eb   :  { %719 = vpow2.f32 %v369_v36 }
 0x1f5   :  { %v720_v37 = vpop.eup %719 }
 0x1f6   :  { %v371_v38 = vadd.f32 1.0, %v720_v37 }
 0x1f8   :  { %721 = vrcp.f32 %v371_v38 }
 0x202   :  { %v722_v45 = vpop.eup %721 }
 0x203   :  { %v382_v46 = vrot.slane %v722_v45, %v381_v44 }
 0x205   :  { %v383_v48 = vcombine.high %v382_v46, %v382_v46  ;;  %v390_v49 = vrot.slane %v382_v46, %v381_v44 }
 0x207   :  { %v401_v51 = vrot.slane %v390_v49, %v400_v47  ;;  %v397_v53 = vrot.slane %v383_v48, %v381_v44 }
 0x209   :  { %v408_v54 = vmul.f32 %v401_v51, %v374_v50  ;;  %v405_v57 = vrot.slane %v397_v53, %v400_v47 }
 0x20b   :  { %v410_v55 = vpack.c.bf16 %v408_v54, %v408_v54  ;;  %v409_v58 = vmul.f32 %v405_v57, %v374_v50 }
 0x20d   :  { %572 = vmatmul.mubr.msk.bf16.vlgmr.msra.gmra.mrb[4].mxu1 %vm419_vm4, %v410_v55  ;;  %v411_v59 = vpack.c.bf16 %v409_v58, %v409_v58 }
 0x20e   :  { %485 = vmatpush1.bf16.msra.mxu1 %v479_v56  ;;  %516 = vmatprep.mubr.bf16.mxu1 %v726_v28 }
 0x215   :  { %576 = vmatmul.mubr.msk.bf16.vlgmr.msra.gmra.mrb[8].mxu1 %vm419_vm4, %v411_v59 }
 0x2e0   :  { %v463_v60 = vpop.f32.mrb[4].mxu1 }
 0x2e1   :  { %v465_v61 = vpop.f32.mrb[5].mxu1 }
 0x2e2   :  { %v579_v62 = vpack.c.bf16 %v465_v61, %v463_v60  ;;  %v467_v63 = vpop.f32.mrb[6].mxu1 }
 0x2e3   :  { %v468_v0 = vpop.f32.mrb[7].mxu1 }
 0x2e4   :  { %541 = vst [vmem:[%s869_s6] sm:$0xff] %v579_v62 }
 0x2e8   :  { %v518_v1 = vpop.f32.mrb[8].mxu1 }
 0x2e9   :  { %v520_v2 = vpop.f32.mrb[9].mxu1 }
 0x2ea   :  { %v580_v3 = vpack.c.bf16 %v520_v2, %v518_v1  ;;  %v522_v4 = vpop.f32.mrb[10].mxu1 }
 0x2eb   :  { %v523_v5 = vpop.f32.mrb[11].mxu1 }
 0x2ec   :  { %542 = vst [vmem:[%s869_s6 + $0x8] sm:$0xff] %v580_v3 }

</bundles_post_ra>
